<compile_context>
chip_gen: v7x
topology: tpu7x:2x2x1
jax: 0.10.0
libtpu: 0.0.40
codegen_flags: <defaults>
</compile_context>

<pallas_src>
import functools

import jax
import jax.numpy as jnp
from jax import lax
from jax.experimental import pallas as pl
from jax.experimental.pallas import tpu as pltpu

EPS = 1e-5


# ----------------------------- in-kernel helpers -----------------------------

def _erf_approx(z):
    # torch.nn.GELU() is the exact-erf form; use Abramowitz & Stegun 7.1.26
    # (abs err ~1.5e-7).  The 1/(1+p|z|) divide goes through the EUP
    # (approx reciprocal) plus one Newton step to stay well below 1e-6.
    a1, a2, a3, a4, a5 = 0.254829592, -0.284496736, 1.421413741, -1.453152027, 1.061405429
    p = 0.3275911
    sgn = jnp.where(z >= 0.0, 1.0, -1.0)
    za = jnp.abs(z)
    d = 1.0 + p * za
    t = pl.reciprocal(d, approx=True)
    t = t * (2.0 - d * t)                      # one Newton step (VPU, cheap)
    poly = ((((a5 * t + a4) * t + a3) * t + a2) * t + a1) * t
    return sgn * (1.0 - poly * jnp.exp(-za * za))


def _gelu_exact(x):
    return 0.5 * x * (1.0 + _erf_approx(x * 0.7071067811865476))


# --------------------------------- kernel ------------------------------------

def _block_kernel(x_ref, cp_ref, wp_ref, out_ref, *, batch, chan, width):
    # x_ref : (N*C, H*W)  activations, HW on lanes, (n,c) folded on sublanes
    # cp_ref: (N*C, 15)   [g1, be1, g2, be2, dw_bias, b2, tap0..tap8] columns
    # wp_ref: (CH, 2C+1)  [W1 cols (C), b1, W2^T cols (C)]
    N, C, W = batch, chan, width
    NC, HW = x_ref.shape
    CH = wp_ref.shape[0]
    NHW = N * HW
    inv_m = 1.0 / float(N * HW)                # hoisted BN scale

    x = x_ref[...]
    cp = cp_ref[...]
    wp = wp_ref[...]

    g1, be1 = cp[:, 0:1], cp[:, 1:2]
    g2, be2 = cp[:, 2:3], cp[:, 3:4]
    dwb, b2t = cp[:, 4:5], cp[:, 5:6]
    taps = [cp[:, 6 + t:7 + t] for t in range(9)]        # each (NC, 1)

    def cbn(v, gamma, beta):
        # Training-mode BN stats per channel over (N, HW): one pass gives
        # sum(x) and sum(x*x); the batch combine is a sublane roll-by-C + add.
        s1 = jnp.sum(v, axis=1, keepdims=True)            # (NC, 1)
        s2 = jnp.sum(v * v, axis=1, keepdims=True)        # (NC, 1)
        t1, t2 = s1, s2
        for k in range(1, N):
            t1 = t1 + pltpu.roll(s1, k * C, axis=0)
            t2 = t2 + pltpu.roll(s2, k * C, axis=0)
        mean = t1 * inv_m
        var = jnp.maximum(t2 * inv_m - mean * mean, 0.0)   # clamp: no NaN rsqrt
        r = lax.rsqrt(var + EPS)
        r = r * (1.5 - 0.5 * (var + EPS) * r * r)          # one Newton step (tiny)
        scale = gamma * r                                  # (NC, 1)
        shift = beta - scale * mean
        return v * scale + shift                           # 2 dense VPU passes

    # boundary-column masks built in-kernel (no extra DMA'd inputs)
    hw_idx = lax.broadcasted_iota(jnp.int32, (1, HW), 1)
    if (W & (W - 1)) == 0:
        col = jnp.bitwise_and(hw_idx, W - 1)
    else:
        col = lax.rem(hw_idx, W)
    is_first_col = col == 0
    is_last_col = col == (W - 1)

    # ------- branch 1: CBN -> circular 3x3 depthwise conv -> + skip ----------
    h = cbn(x, g1, be1)
    # dx = -1 / +1 column shifts: lane roll (XLU) + wrap fixup at the W boundary
    col_m = jnp.where(is_first_col,
                      pltpu.roll(h, (1 - W) % HW, axis=1),
                      pltpu.roll(h, 1, axis=1))
    col_p = jnp.where(is_last_col,
                      pltpu.roll(h, W - 1, axis=1),
                      pltpu.roll(h, HW - 1, axis=1))
    cols = (col_m, h, col_p)
    acc = taps[4] * h                                      # centre tap
    for dy in range(3):
        row_shift = (-(dy - 1) * W) % HW                   # whole-row roll: exact H wrap
        for dx in range(3):
            if dy == 1 and dx == 1:
                continue
            base = cols[dx]
            shifted = base if row_shift == 0 else pltpu.roll(base, row_shift, axis=1)
            acc = acc + taps[dy * 3 + dx] * shifted
    x1 = acc + dwb + x                                     # + skip

    # ------- branch 2: CBN -> 1x1 conv -> GELU -> 1x1 conv -> + skip ---------
    h2 = cbn(x1, g2, be2)
    # Relayout (NC, HW) -> (C, N*HW): channel on sublanes, batch on lanes, so
    # the GELU input (CH, N*HW) = (8, 512) is fully dense.
    h2r = jnp.concatenate([h2[i * C:(i + 1) * C, :] for i in range(N)], axis=1)
    b1 = wp[:, C:C + 1]                                    # (CH, 1)
    a = b1
    for ci in range(C):                                    # 1x1 conv #1: broadcast-FMA
        a = a + wp[:, ci:ci + 1] * h2r[ci:ci + 1, :]       # (CH,1)*(1,NHW) -> (CH,NHW)
    g = _gelu_exact(a)                                     # dense (CH, N*HW)
    rows = []
    for co in range(C):                                    # 1x1 conv #2: weighted sublane reduce
        w2c = wp[:, C + 1 + co:C + 2 + co]                 # (CH, 1) = W2[co, :]
        rows.append(jnp.sum(w2c * g, axis=0, keepdims=True))
    yr = jnp.concatenate(rows, axis=0)                     # (C, N*HW)
    # Relayout back to (NC, HW), add conv-2 bias and the residual.
    y = jnp.concatenate([yr[:, i * HW:(i + 1) * HW] for i in range(N)], axis=0)
    out_ref[...] = y + b2t + x1                            # full-width unmasked store


# -------------------------------- wrapper -------------------------------------

def _full_spec(shape):
    return pl.BlockSpec(shape, lambda *_: (0,) * len(shape))


def mlp_cbn_single_dw_block(x_nchw, label, kp):
    """kp: dict of kernel-layout params (see _to_kernel_params)."""
    N, C, H, W = x_nchw.shape
    HW, NC = H * W, N * C
    x_flat = x_nchw.reshape(NC, HW).astype(jnp.float32)    # free row-major reshape

    # Label embedding is ~128 MACs of layout plumbing: done here so the kernel
    # receives gamma/beta already as (N*C, 1) columns.
    def affine(ew, eb):
        gb = jnp.dot(label.astype(jnp.float32), ew,
                     precision=lax.Precision.HIGHEST) + eb          # (N, 2C)
        return gb[:, :C].reshape(NC, 1), gb[:, C:].reshape(NC, 1)

    g1, be1 = affine(kp["e1w"], kp["e1b"])
    g2, be2 = affine(kp["e2w"], kp["e2b"])

    # Pack all tiny per-row params into one (NC, 15) array (fewer kernel DMAs).
    cp = jnp.concatenate([g1, be1, g2, be2, kp["dwb"], kp["b2t"], kp["taps"]], axis=1)
    wp = kp["wp"]                                           # (CH, 2C+1)

    out = pl.pallas_call(
        functools.partial(_block_kernel, batch=N, chan=C, width=W),
        out_shape=jax.ShapeDtypeStruct((NC, HW), jnp.float32),
        grid=(1,),
        in_specs=[_full_spec(x_flat.shape), _full_spec(cp.shape), _full_spec(wp.shape)],
        out_specs=_full_spec((NC, HW)),
        compiler_params=pltpu.CompilerParams(dimension_semantics=("arbitrary",)),
    )(x_flat, cp, wp)
    return out.reshape(N, C, H, W)                          # free reshape


def _to_kernel_params(p, N, C):
    CH = 2 * C
    taps = jnp.tile(p["conv1_w"].reshape(C, 9), (N, 1))     # (NC, 9), col t = tap dy*3+dx
    dwb = jnp.tile(p["conv1_b"].reshape(C, 1), (N, 1))      # (NC, 1)
    b2t = jnp.tile(p["convb_b"].reshape(C, 1), (N, 1))      # (NC, 1)
    w1 = p["conva_w"].reshape(CH, C)                        # (CH, C):  W1[o, c]
    b1 = p["conva_b"].reshape(CH, 1)
    w2c = p["convb_w"].reshape(C, CH).T                     # (CH, C):  [o, co] = W2[co, o]
    wp = jnp.concatenate([w1, b1, w2c], axis=1)             # (CH, 2C+1)
    return {
        "e1w": p["e1w"].T, "e1b": p["e1b"].reshape(1, CH),  # used in the wrapper
        "e2w": p["e2w"].T, "e2b": p["e2b"].reshape(1, CH),
        "dwb": dwb, "b2t": b2t, "taps": taps, "wp": wp,
    }


# --------------------------- pure-JAX reference --------------------------------

def reference_forward(x, label, p):
    C = x.shape[1]
    prec = lax.Precision.HIGHEST

    def cbn(v, w, b):
        mean = v.mean(axis=(0, 2, 3), keepdims=True)
        var = ((v - mean) ** 2).mean(axis=(0, 2, 3), keepdims=True)
        vn = (v - mean) / jnp.sqrt(var + EPS)
        gb = jnp.dot(label, w.T, precision=prec) + b
        gamma = gb[:, :C][:, :, None, None]
        beta = gb[:, C:][:, :, None, None]
        return gamma * vn + beta

    skip = x
    h = cbn(x, p["e1w"], p["e1b"])
    hp = jnp.pad(h, ((0, 0), (0, 0), (1, 1), (1, 1)), mode="wrap")   # circle_padding
    y = lax.conv_general_dilated(hp, p["conv1_w"], (1, 1), "VALID",
                                 feature_group_count=C,
                                 dimension_numbers=("NCHW", "OIHW", "NCHW"),
                                 precision=prec)
    y = y + p["conv1_b"][None, :, None, None]
    x = y + skip
    skip = x
    h = cbn(x, p["e2w"], p["e2b"])
    a = jnp.einsum("oc,nchw->nohw", p["conva_w"].reshape(2 * C, C), h,
                   precision=prec) + p["conva_b"][None, :, None, None]
    g = jax.nn.gelu(a, approximate=False)
    o = jnp.einsum("oc,nchw->nohw", p["convb_w"].reshape(C, 2 * C), g,
                   precision=prec) + p["convb_b"][None, :, None, None]
    return o + skip


# ------------------------------------ main --------------------------------------

if __name__ == "__main__":
    N, C, H, W, L = 2, 4, 16, 16, 8      # batch, channels, spatial, label dim
    CH = 2 * C                           # channel_hidden = channel * 2
    key = jax.random.PRNGKey(0)
    ks = jax.random.split(key, 12)

    x = jax.random.normal(ks[0], (N, C, H, W), jnp.float32)      # NCHW, like PyTorch
    label = jax.random.normal(ks[1], (N, L), jnp.float32)

    def nrm(k, shape, scale=0.2):
        return scale * jax.random.normal(k, shape, jnp.float32)

    # gamma-bias init near 1, beta-bias near 0 (typical conditional-BN init)
    gb_bias = jnp.concatenate([jnp.ones((C,), jnp.float32), jnp.zeros((C,), jnp.float32)])
    params = {
        "e1w": nrm(ks[2], (CH, L)),   "e1b": gb_bias + nrm(ks[3], (CH,), 0.05),
        "e2w": nrm(ks[4], (CH, L)),   "e2b": gb_bias + nrm(ks[5], (CH,), 0.05),
        "conv1_w": nrm(ks[6], (C, 1, 3, 3)),      "conv1_b": nrm(ks[7], (C,), 0.05),
        "conva_w": nrm(ks[8], (CH, C, 1, 1)),     "conva_b": nrm(ks[9], (CH,), 0.05),
        "convb_w": nrm(ks[10], (C, CH, 1, 1)),    "convb_b": nrm(ks[11], (C,), 0.05),
    }
    kparams = _to_kernel_params(params, N, C)

    out = jax.jit(mlp_cbn_single_dw_block)(x, label, kparams)
    jax.block_until_ready(out)

    ref = reference_forward(x, label, params)
    max_err = float(jnp.max(jnp.abs(out - ref)))
    assert out.shape == (N, C, H, W) and out.dtype == jnp.float32
    assert max_err < 1e-3, f"kernel/reference mismatch: max abs err = {max_err}"
    print("KERNEL_OK")
</pallas_src>

<mosaic_0001>
module attributes {stable_mosaic.version = 11 : i64} {
  func.func @_block_kernel(%arg0: i32, %arg1: memref<8x256xf32, #tpu.memory_space<vmem>>, %arg2: memref<8x15xf32, #tpu.memory_space<vmem>>, %arg3: memref<8x9xf32, #tpu.memory_space<vmem>>, %arg4: memref<8x256xf32, #tpu.memory_space<vmem>>) attributes {dimension_semantics = [#tpu.dimension_semantics<arbitrary>], iteration_bounds = array<i64: 1>, scalar_prefetch = 0 : i64, scratch_operands = 0 : i64, tpu.core_type = #tpu.core_type<tc>, window_params = [{pipeline_mode = #tpu.pipeline_mode<synchronous>, transform_indices = @transform_0, window_bounds = array<i64: 8, 256>}, {pipeline_mode = #tpu.pipeline_mode<synchronous>, transform_indices = @transform_1, window_bounds = array<i64: 8, 15>}, {pipeline_mode = #tpu.pipeline_mode<synchronous>, transform_indices = @transform_2, window_bounds = array<i64: 8, 9>}, {pipeline_mode = #tpu.pipeline_mode<synchronous>, transform_indices = @transform_3, window_bounds = array<i64: 8, 256>}]} {
    %c0 = arith.constant 0 : index
    %c0_0 = arith.constant 0 : index
    %0 = vector.load %arg1[%c0, %c0_0] : memref<8x256xf32, #tpu.memory_space<vmem>>, vector<8x256xf32>
    %c0_1 = arith.constant 0 : index
    %c0_2 = arith.constant 0 : index
    %1 = vector.load %arg2[%c0_1, %c0_2] : memref<8x15xf32, #tpu.memory_space<vmem>>, vector<8x15xf32>
    %c0_3 = arith.constant 0 : index
    %c0_4 = arith.constant 0 : index
    %2 = vector.load %arg3[%c0_3, %c0_4] : memref<8x9xf32, #tpu.memory_space<vmem>>, vector<8x9xf32>
    %3 = vector.extract_strided_slice %1 {offsets = [0, 0], sizes = [8, 1], strides = [1, 1]} : vector<8x15xf32> to vector<8x1xf32>
    %4 = vector.extract_strided_slice %1 {offsets = [0, 1], sizes = [8, 1], strides = [1, 1]} : vector<8x15xf32> to vector<8x1xf32>
    %5 = vector.extract_strided_slice %1 {offsets = [0, 2], sizes = [8, 1], strides = [1, 1]} : vector<8x15xf32> to vector<8x1xf32>
    %6 = vector.extract_strided_slice %1 {offsets = [0, 3], sizes = [8, 1], strides = [1, 1]} : vector<8x15xf32> to vector<8x1xf32>
    %7 = vector.extract_strided_slice %1 {offsets = [0, 4], sizes = [8, 1], strides = [1, 1]} : vector<8x15xf32> to vector<8x1xf32>
    %8 = vector.extract_strided_slice %1 {offsets = [0, 5], sizes = [8, 1], strides = [1, 1]} : vector<8x15xf32> to vector<8x1xf32>
    %9 = vector.extract_strided_slice %1 {offsets = [0, 6], sizes = [8, 1], strides = [1, 1]} : vector<8x15xf32> to vector<8x1xf32>
    %10 = vector.extract_strided_slice %1 {offsets = [0, 7], sizes = [8, 1], strides = [1, 1]} : vector<8x15xf32> to vector<8x1xf32>
    %11 = vector.extract_strided_slice %1 {offsets = [0, 8], sizes = [8, 1], strides = [1, 1]} : vector<8x15xf32> to vector<8x1xf32>
    %12 = vector.extract_strided_slice %1 {offsets = [0, 9], sizes = [8, 1], strides = [1, 1]} : vector<8x15xf32> to vector<8x1xf32>
    %13 = vector.extract_strided_slice %1 {offsets = [0, 10], sizes = [8, 1], strides = [1, 1]} : vector<8x15xf32> to vector<8x1xf32>
    %14 = vector.extract_strided_slice %1 {offsets = [0, 11], sizes = [8, 1], strides = [1, 1]} : vector<8x15xf32> to vector<8x1xf32>
    %15 = vector.extract_strided_slice %1 {offsets = [0, 12], sizes = [8, 1], strides = [1, 1]} : vector<8x15xf32> to vector<8x1xf32>
    %16 = vector.extract_strided_slice %1 {offsets = [0, 13], sizes = [8, 1], strides = [1, 1]} : vector<8x15xf32> to vector<8x1xf32>
    %17 = vector.extract_strided_slice %1 {offsets = [0, 14], sizes = [8, 1], strides = [1, 1]} : vector<8x15xf32> to vector<8x1xf32>
    %18 = tpu.iota {dimensions = array<i32: 1>} : vector<1x256xi32>
    %c15_i32 = arith.constant 15 : i32
    %19 = vector.broadcast %c15_i32 : i32 to vector<1x256xi32>
    %20 = arith.andi %18, %19 : vector<1x256xi32>
    %c0_i32 = arith.constant 0 : i32
    %21 = vector.broadcast %c0_i32 : i32 to vector<1x256xi32>
    %22 = arith.cmpi eq, %20, %21 : vector<1x256xi32>
    %c15_i32_5 = arith.constant 15 : i32
    %23 = vector.broadcast %c15_i32_5 : i32 to vector<1x256xi32>
    %24 = arith.cmpi eq, %20, %23 : vector<1x256xi32>
    %cst = arith.constant dense<0.000000e+00> : vector<8xf32>
    %25 = vector.multi_reduction <add>, %0, %cst [1] : vector<8x256xf32> to vector<8xf32>
    %26 = vector.shape_cast %25 : vector<8xf32> to vector<8x1xf32>
    %27 = arith.mulf %0, %0 : vector<8x256xf32>
    %cst_6 = arith.constant dense<0.000000e+00> : vector<8xf32>
    %28 = vector.multi_reduction <add>, %27, %cst_6 [1] : vector<8x256xf32> to vector<8xf32>
    %29 = vector.shape_cast %28 : vector<8xf32> to vector<8x1xf32>
    %c4_i32 = arith.constant 4 : i32
    %30 = tpu.dynamic_rotate %26 by %c4_i32 dim 0 : vector<8x1xf32>, i32 -> vector<8x1xf32>
    %31 = arith.addf %26, %30 : vector<8x1xf32>
    %c4_i32_7 = arith.constant 4 : i32
    %32 = tpu.dynamic_rotate %29 by %c4_i32_7 dim 0 : vector<8x1xf32>, i32 -> vector<8x1xf32>
    %33 = arith.addf %29, %32 : vector<8x1xf32>
    %cst_8 = arith.constant 0.001953125 : f32
    %34 = vector.broadcast %cst_8 : f32 to vector<8x1xf32>
    %35 = arith.mulf %31, %34 : vector<8x1xf32>
    %cst_9 = arith.constant 0.001953125 : f32
    %36 = vector.broadcast %cst_9 : f32 to vector<8x1xf32>
    %37 = arith.mulf %33, %36 : vector<8x1xf32>
    %38 = arith.mulf %35, %35 : vector<8x1xf32>
    %39 = arith.subf %37, %38 : vector<8x1xf32>
    %cst_10 = arith.constant 0.000000e+00 : f32
    %40 = vector.broadcast %cst_10 : f32 to vector<8x1xf32>
    %41 = arith.maximumf %39, %40 : vector<8x1xf32>
    %cst_11 = arith.constant 9.99999974E-6 : f32
    %42 = vector.broadcast %cst_11 : f32 to vector<8x1xf32>
    %43 = arith.addf %41, %42 : vector<8x1xf32>
    %44 = math.rsqrt %43 : vector<8x1xf32>
    %cst_12 = arith.constant 9.99999974E-6 : f32
    %45 = vector.broadcast %cst_12 : f32 to vector<8x1xf32>
    %46 = arith.addf %41, %45 : vector<8x1xf32>
    %cst_13 = arith.constant 5.000000e-01 : f32
    %47 = vector.broadcast %cst_13 : f32 to vector<8x1xf32>
    %48 = arith.mulf %47, %46 : vector<8x1xf32>
    %49 = arith.mulf %48, %44 : vector<8x1xf32>
    %50 = arith.mulf %49, %44 : vector<8x1xf32>
    %cst_14 = arith.constant 1.500000e+00 : f32
    %51 = vector.broadcast %cst_14 : f32 to vector<8x1xf32>
    %52 = arith.subf %51, %50 : vector<8x1xf32>
    %53 = arith.mulf %44, %52 : vector<8x1xf32>
    %54 = arith.mulf %3, %53 : vector<8x1xf32>
    %55 = arith.mulf %54, %35 : vector<8x1xf32>
    %56 = arith.subf %4, %55 : vector<8x1xf32>
    %57 = vector.broadcast %54 : vector<8x1xf32> to vector<8x256xf32>
    %58 = arith.mulf %0, %57 : vector<8x256xf32>
    %59 = vector.broadcast %56 : vector<8x1xf32> to vector<8x256xf32>
    %60 = arith.addf %58, %59 : vector<8x256xf32>
    %c241_i32 = arith.constant 241 : i32
    %61 = tpu.dynamic_rotate %60 by %c241_i32 dim 1 : vector<8x256xf32>, i32 -> vector<8x256xf32>
    %c1_i32 = arith.constant 1 : i32
    %62 = tpu.dynamic_rotate %60 by %c1_i32 dim 1 : vector<8x256xf32>, i32 -> vector<8x256xf32>
    %63 = vector.shape_cast %22 : vector<1x256xi1> to vector<1x256xi1>
    %64 = vector.broadcast %63 : vector<1x256xi1> to vector<8x256xi1>
    %65 = arith.select %64, %61, %62 : vector<8x256xi1>, vector<8x256xf32>
    %c15_i32_15 = arith.constant 15 : i32
    %66 = tpu.dynamic_rotate %60 by %c15_i32_15 dim 1 : vector<8x256xf32>, i32 -> vector<8x256xf32>
    %c255_i32 = arith.constant 255 : i32
    %67 = tpu.dynamic_rotate %60 by %c255_i32 dim 1 : vector<8x256xf32>, i32 -> vector<8x256xf32>
    %68 = vector.shape_cast %24 : vector<1x256xi1> to vector<1x256xi1>
    %69 = vector.broadcast %68 : vector<1x256xi1> to vector<8x256xi1>
    %70 = arith.select %69, %66, %67 : vector<8x256xi1>, vector<8x256xf32>
    %71 = vector.broadcast %13 : vector<8x1xf32> to vector<8x256xf32>
    %72 = arith.mulf %71, %60 : vector<8x256xf32>
    %c16_i32 = arith.constant 16 : i32
    %73 = tpu.dynamic_rotate %65 by %c16_i32 dim 1 : vector<8x256xf32>, i32 -> vector<8x256xf32>
    %74 = vector.broadcast %9 : vector<8x1xf32> to vector<8x256xf32>
    %75 = arith.mulf %74, %73 : vector<8x256xf32>
    %76 = arith.addf %72, %75 : vector<8x256xf32>
    %c16_i32_16 = arith.constant 16 : i32
    %77 = tpu.dynamic_rotate %60 by %c16_i32_16 dim 1 : vector<8x256xf32>, i32 -> vector<8x256xf32>
    %78 = vector.broadcast %10 : vector<8x1xf32> to vector<8x256xf32>
    %79 = arith.mulf %78, %77 : vector<8x256xf32>
    %80 = arith.addf %76, %79 : vector<8x256xf32>
    %c16_i32_17 = arith.constant 16 : i32
    %81 = tpu.dynamic_rotate %70 by %c16_i32_17 dim 1 : vector<8x256xf32>, i32 -> vector<8x256xf32>
    %82 = vector.broadcast %11 : vector<8x1xf32> to vector<8x256xf32>
    %83 = arith.mulf %82, %81 : vector<8x256xf32>
    %84 = arith.addf %80, %83 : vector<8x256xf32>
    %85 = vector.broadcast %12 : vector<8x1xf32> to vector<8x256xf32>
    %86 = arith.mulf %85, %65 : vector<8x256xf32>
    %87 = arith.addf %84, %86 : vector<8x256xf32>
    %88 = vector.broadcast %14 : vector<8x1xf32> to vector<8x256xf32>
    %89 = arith.mulf %88, %70 : vector<8x256xf32>
    %90 = arith.addf %87, %89 : vector<8x256xf32>
    %c240_i32 = arith.constant 240 : i32
    %91 = tpu.dynamic_rotate %65 by %c240_i32 dim 1 : vector<8x256xf32>, i32 -> vector<8x256xf32>
    %92 = vector.broadcast %15 : vector<8x1xf32> to vector<8x256xf32>
    %93 = arith.mulf %92, %91 : vector<8x256xf32>
    %94 = arith.addf %90, %93 : vector<8x256xf32>
    %c240_i32_18 = arith.constant 240 : i32
    %95 = tpu.dynamic_rotate %60 by %c240_i32_18 dim 1 : vector<8x256xf32>, i32 -> vector<8x256xf32>
    %96 = vector.broadcast %16 : vector<8x1xf32> to vector<8x256xf32>
    %97 = arith.mulf %96, %95 : vector<8x256xf32>
    %98 = arith.addf %94, %97 : vector<8x256xf32>
    %c240_i32_19 = arith.constant 240 : i32
    %99 = tpu.dynamic_rotate %70 by %c240_i32_19 dim 1 : vector<8x256xf32>, i32 -> vector<8x256xf32>
    %100 = vector.broadcast %17 : vector<8x1xf32> to vector<8x256xf32>
    %101 = arith.mulf %100, %99 : vector<8x256xf32>
    %102 = arith.addf %98, %101 : vector<8x256xf32>
    %103 = vector.broadcast %7 : vector<8x1xf32> to vector<8x256xf32>
    %104 = arith.addf %102, %103 : vector<8x256xf32>
    %105 = arith.addf %104, %0 : vector<8x256xf32>
    %cst_20 = arith.constant dense<0.000000e+00> : vector<8xf32>
    %106 = vector.multi_reduction <add>, %105, %cst_20 [1] : vector<8x256xf32> to vector<8xf32>
    %107 = vector.shape_cast %106 : vector<8xf32> to vector<8x1xf32>
    %108 = arith.mulf %105, %105 : vector<8x256xf32>
    %cst_21 = arith.constant dense<0.000000e+00> : vector<8xf32>
    %109 = vector.multi_reduction <add>, %108, %cst_21 [1] : vector<8x256xf32> to vector<8xf32>
    %110 = vector.shape_cast %109 : vector<8xf32> to vector<8x1xf32>
    %c4_i32_22 = arith.constant 4 : i32
    %111 = tpu.dynamic_rotate %107 by %c4_i32_22 dim 0 : vector<8x1xf32>, i32 -> vector<8x1xf32>
    %112 = arith.addf %107, %111 : vector<8x1xf32>
    %c4_i32_23 = arith.constant 4 : i32
    %113 = tpu.dynamic_rotate %110 by %c4_i32_23 dim 0 : vector<8x1xf32>, i32 -> vector<8x1xf32>
    %114 = arith.addf %110, %113 : vector<8x1xf32>
    %cst_24 = arith.constant 0.001953125 : f32
    %115 = vector.broadcast %cst_24 : f32 to vector<8x1xf32>
    %116 = arith.mulf %112, %115 : vector<8x1xf32>
    %cst_25 = arith.constant 0.001953125 : f32
    %117 = vector.broadcast %cst_25 : f32 to vector<8x1xf32>
    %118 = arith.mulf %114, %117 : vector<8x1xf32>
    %119 = arith.mulf %116, %116 : vector<8x1xf32>
    %120 = arith.subf %118, %119 : vector<8x1xf32>
    %cst_26 = arith.constant 0.000000e+00 : f32
    %121 = vector.broadcast %cst_26 : f32 to vector<8x1xf32>
    %122 = arith.maximumf %120, %121 : vector<8x1xf32>
    %cst_27 = arith.constant 9.99999974E-6 : f32
    %123 = vector.broadcast %cst_27 : f32 to vector<8x1xf32>
    %124 = arith.addf %122, %123 : vector<8x1xf32>
    %125 = math.rsqrt %124 : vector<8x1xf32>
    %cst_28 = arith.constant 9.99999974E-6 : f32
    %126 = vector.broadcast %cst_28 : f32 to vector<8x1xf32>
    %127 = arith.addf %122, %126 : vector<8x1xf32>
    %cst_29 = arith.constant 5.000000e-01 : f32
    %128 = vector.broadcast %cst_29 : f32 to vector<8x1xf32>
    %129 = arith.mulf %128, %127 : vector<8x1xf32>
    %130 = arith.mulf %129, %125 : vector<8x1xf32>
    %131 = arith.mulf %130, %125 : vector<8x1xf32>
    %cst_30 = arith.constant 1.500000e+00 : f32
    %132 = vector.broadcast %cst_30 : f32 to vector<8x1xf32>
    %133 = arith.subf %132, %131 : vector<8x1xf32>
    %134 = arith.mulf %125, %133 : vector<8x1xf32>
    %135 = arith.mulf %5, %134 : vector<8x1xf32>
    %136 = arith.mulf %135, %116 : vector<8x1xf32>
    %137 = arith.subf %6, %136 : vector<8x1xf32>
    %138 = vector.broadcast %135 : vector<8x1xf32> to vector<8x256xf32>
    %139 = arith.mulf %105, %138 : vector<8x256xf32>
    %140 = vector.broadcast %137 : vector<8x1xf32> to vector<8x256xf32>
    %141 = arith.addf %139, %140 : vector<8x256xf32>
    %142 = vector.extract_strided_slice %141 {offsets = [0, 0], sizes = [4, 256], strides = [1, 1]} : vector<8x256xf32> to vector<4x256xf32>
    %143 = vector.extract_strided_slice %141 {offsets = [4, 0], sizes = [4, 256], strides = [1, 1]} : vector<8x256xf32> to vector<4x256xf32>
    %144 = tpu.concatenate %142, %143 in 1 : vector<4x256xf32>, vector<4x256xf32> -> vector<4x512xf32>
    %145 = vector.extract_strided_slice %2 {offsets = [0, 4], sizes = [8, 1], strides = [1, 1]} : vector<8x9xf32> to vector<8x1xf32>
    %146 = vector.extract_strided_slice %2 {offsets = [0, 0], sizes = [8, 1], strides = [1, 1]} : vector<8x9xf32> to vector<8x1xf32>
    %147 = vector.extract_strided_slice %144 {offsets = [0, 0], sizes = [1, 512], strides = [1, 1]} : vector<4x512xf32> to vector<1x512xf32>
    %148 = vector.broadcast %146 : vector<8x1xf32> to vector<8x512xf32>
    %149 = vector.broadcast %147 : vector<1x512xf32> to vector<8x512xf32>
    %150 = arith.mulf %148, %149 : vector<8x512xf32>
    %151 = vector.broadcast %145 : vector<8x1xf32> to vector<8x512xf32>
    %152 = arith.addf %151, %150 : vector<8x512xf32>
    %153 = vector.extract_strided_slice %2 {offsets = [0, 1], sizes = [8, 1], strides = [1, 1]} : vector<8x9xf32> to vector<8x1xf32>
    %154 = vector.extract_strided_slice %144 {offsets = [1, 0], sizes = [1, 512], strides = [1, 1]} : vector<4x512xf32> to vector<1x512xf32>
    %155 = vector.broadcast %153 : vector<8x1xf32> to vector<8x512xf32>
    %156 = vector.broadcast %154 : vector<1x512xf32> to vector<8x512xf32>
    %157 = arith.mulf %155, %156 : vector<8x512xf32>
    %158 = arith.addf %152, %157 : vector<8x512xf32>
    %159 = vector.extract_strided_slice %2 {offsets = [0, 2], sizes = [8, 1], strides = [1, 1]} : vector<8x9xf32> to vector<8x1xf32>
    %160 = vector.extract_strided_slice %144 {offsets = [2, 0], sizes = [1, 512], strides = [1, 1]} : vector<4x512xf32> to vector<1x512xf32>
    %161 = vector.broadcast %159 : vector<8x1xf32> to vector<8x512xf32>
    %162 = vector.broadcast %160 : vector<1x512xf32> to vector<8x512xf32>
    %163 = arith.mulf %161, %162 : vector<8x512xf32>
    %164 = arith.addf %158, %163 : vector<8x512xf32>
    %165 = vector.extract_strided_slice %2 {offsets = [0, 3], sizes = [8, 1], strides = [1, 1]} : vector<8x9xf32> to vector<8x1xf32>
    %166 = vector.extract_strided_slice %144 {offsets = [3, 0], sizes = [1, 512], strides = [1, 1]} : vector<4x512xf32> to vector<1x512xf32>
    %167 = vector.broadcast %165 : vector<8x1xf32> to vector<8x512xf32>
    %168 = vector.broadcast %166 : vector<1x512xf32> to vector<8x512xf32>
    %169 = arith.mulf %167, %168 : vector<8x512xf32>
    %170 = arith.addf %164, %169 : vector<8x512xf32>
    %cst_31 = arith.constant 5.000000e-01 : f32
    %171 = vector.broadcast %cst_31 : f32 to vector<8x512xf32>
    %172 = arith.mulf %171, %170 : vector<8x512xf32>
    %cst_32 = arith.constant 0.707106769 : f32
    %173 = vector.broadcast %cst_32 : f32 to vector<8x512xf32>
    %174 = arith.mulf %170, %173 : vector<8x512xf32>
    %cst_33 = arith.constant 0.000000e+00 : f32
    %175 = vector.broadcast %cst_33 : f32 to vector<8x512xf32>
    %176 = arith.cmpf oge, %174, %175 : vector<8x512xf32>
    %cst_34 = arith.constant 1.000000e+00 : f32
    %cst_35 = arith.constant -1.000000e+00 : f32
    %177 = vector.broadcast %cst_34 : f32 to vector<8x512xf32>
    %178 = vector.broadcast %cst_35 : f32 to vector<8x512xf32>
    %179 = arith.select %176, %177, %178 : vector<8x512xi1>, vector<8x512xf32>
    %180 = math.absf %174 : vector<8x512xf32>
    %cst_36 = arith.constant 0.327591091 : f32
    %181 = vector.broadcast %cst_36 : f32 to vector<8x512xf32>
    %182 = arith.mulf %181, %180 : vector<8x512xf32>
    %cst_37 = arith.constant 1.000000e+00 : f32
    %183 = vector.broadcast %cst_37 : f32 to vector<8x512xf32>
    %184 = arith.addf %183, %182 : vector<8x512xf32>
    %185 = tpu.reciprocal %184 {approx = true} : vector<8x512xf32> -> vector<8x512xf32>
    %186 = arith.mulf %184, %185 : vector<8x512xf32>
    %cst_38 = arith.constant 2.000000e+00 : f32
    %187 = vector.broadcast %cst_38 : f32 to vector<8x512xf32>
    %188 = arith.subf %187, %186 : vector<8x512xf32>
    %189 = arith.mulf %185, %188 : vector<8x512xf32>
    %cst_39 = arith.constant 1.06140542 : f32
    %190 = vector.broadcast %cst_39 : f32 to vector<8x512xf32>
    %191 = arith.mulf %190, %189 : vector<8x512xf32>
    %cst_40 = arith.constant -1.45315206 : f32
    %192 = vector.broadcast %cst_40 : f32 to vector<8x512xf32>
    %193 = arith.addf %191, %192 : vector<8x512xf32>
    %194 = arith.mulf %193, %189 : vector<8x512xf32>
    %cst_41 = arith.constant 1.42141378 : f32
    %195 = vector.broadcast %cst_41 : f32 to vector<8x512xf32>
    %196 = arith.addf %194, %195 : vector<8x512xf32>
    %197 = arith.mulf %196, %189 : vector<8x512xf32>
    %cst_42 = arith.constant -0.284496725 : f32
    %198 = vector.broadcast %cst_42 : f32 to vector<8x512xf32>
    %199 = arith.addf %197, %198 : vector<8x512xf32>
    %200 = arith.mulf %199, %189 : vector<8x512xf32>
    %cst_43 = arith.constant 0.254829586 : f32
    %201 = vector.broadcast %cst_43 : f32 to vector<8x512xf32>
    %202 = arith.addf %200, %201 : vector<8x512xf32>
    %203 = arith.mulf %202, %189 : vector<8x512xf32>
    %cst_44 = arith.constant 0.000000e+00 : f32
    %204 = vector.broadcast %cst_44 : f32 to vector<8x512xf32>
    %205 = arith.subf %204, %180 : vector<8x512xf32>
    %206 = arith.mulf %205, %180 : vector<8x512xf32>
    %207 = math.exp %206 : vector<8x512xf32>
    %208 = arith.mulf %203, %207 : vector<8x512xf32>
    %cst_45 = arith.constant 1.000000e+00 : f32
    %209 = vector.broadcast %cst_45 : f32 to vector<8x512xf32>
    %210 = arith.subf %209, %208 : vector<8x512xf32>
    %211 = arith.mulf %179, %210 : vector<8x512xf32>
    %cst_46 = arith.constant 1.000000e+00 : f32
    %212 = vector.broadcast %cst_46 : f32 to vector<8x512xf32>
    %213 = arith.addf %212, %211 : vector<8x512xf32>
    %214 = arith.mulf %172, %213 : vector<8x512xf32>
    %215 = vector.extract_strided_slice %2 {offsets = [0, 5], sizes = [8, 1], strides = [1, 1]} : vector<8x9xf32> to vector<8x1xf32>
    %216 = vector.broadcast %215 : vector<8x1xf32> to vector<8x512xf32>
    %217 = arith.mulf %216, %214 : vector<8x512xf32>
    %cst_47 = arith.constant dense<0.000000e+00> : vector<512xf32>
    %218 = vector.multi_reduction <add>, %217, %cst_47 [0] : vector<8x512xf32> to vector<512xf32>
    %219 = vector.shape_cast %218 : vector<512xf32> to vector<1x512xf32>
    %220 = vector.extract_strided_slice %2 {offsets = [0, 6], sizes = [8, 1], strides = [1, 1]} : vector<8x9xf32> to vector<8x1xf32>
    %221 = vector.broadcast %220 : vector<8x1xf32> to vector<8x512xf32>
    %222 = arith.mulf %221, %214 : vector<8x512xf32>
    %cst_48 = arith.constant dense<0.000000e+00> : vector<512xf32>
    %223 = vector.multi_reduction <add>, %222, %cst_48 [0] : vector<8x512xf32> to vector<512xf32>
    %224 = vector.shape_cast %223 : vector<512xf32> to vector<1x512xf32>
    %225 = vector.extract_strided_slice %2 {offsets = [0, 7], sizes = [8, 1], strides = [1, 1]} : vector<8x9xf32> to vector<8x1xf32>
    %226 = vector.broadcast %225 : vector<8x1xf32> to vector<8x512xf32>
    %227 = arith.mulf %226, %214 : vector<8x512xf32>
    %cst_49 = arith.constant dense<0.000000e+00> : vector<512xf32>
    %228 = vector.multi_reduction <add>, %227, %cst_49 [0] : vector<8x512xf32> to vector<512xf32>
    %229 = vector.shape_cast %228 : vector<512xf32> to vector<1x512xf32>
    %230 = vector.extract_strided_slice %2 {offsets = [0, 8], sizes = [8, 1], strides = [1, 1]} : vector<8x9xf32> to vector<8x1xf32>
    %231 = vector.broadcast %230 : vector<8x1xf32> to vector<8x512xf32>
    %232 = arith.mulf %231, %214 : vector<8x512xf32>
    %cst_50 = arith.constant dense<0.000000e+00> : vector<512xf32>
    %233 = vector.multi_reduction <add>, %232, %cst_50 [0] : vector<8x512xf32> to vector<512xf32>
    %234 = vector.shape_cast %233 : vector<512xf32> to vector<1x512xf32>
    %235 = tpu.concatenate %219, %224, %229, %234 in 0 : vector<1x512xf32>, vector<1x512xf32>, vector<1x512xf32>, vector<1x512xf32> -> vector<4x512xf32>
    %236 = vector.extract_strided_slice %235 {offsets = [0, 0], sizes = [4, 256], strides = [1, 1]} : vector<4x512xf32> to vector<4x256xf32>
    %237 = vector.extract_strided_slice %235 {offsets = [0, 256], sizes = [4, 256], strides = [1, 1]} : vector<4x512xf32> to vector<4x256xf32>
    %238 = tpu.concatenate %236, %237 in 0 : vector<4x256xf32>, vector<4x256xf32> -> vector<8x256xf32>
    %239 = vector.broadcast %8 : vector<8x1xf32> to vector<8x256xf32>
    %240 = arith.addf %238, %239 : vector<8x256xf32>
    %241 = arith.addf %240, %105 : vector<8x256xf32>
    %c0_51 = arith.constant 0 : index
    %c0_52 = arith.constant 0 : index
    %242 = vector.load %arg4[%c0_51, %c0_52] : memref<8x256xf32, #tpu.memory_space<vmem>>, vector<8x256xf32>
    tpu.vector_store %arg4[%c0_51, %c0_52], %241 {strides = array<i32>} : memref<8x256xf32, #tpu.memory_space<vmem>>, vector<8x256xf32>,
    return
  }
  func.func @transform_0(%arg0: i32) -> (i32, i32) {
    %c0_i32 = arith.constant 0 : i32
    %c0_i32_0 = arith.constant 0 : i32
    %c0_i32_1 = arith.constant 0 : i32
    return %c0_i32, %c0_i32_0 : i32, i32
  }
  func.func @transform_1(%arg0: i32) -> (i32, i32) {
    %c0_i32 = arith.constant 0 : i32
    %c0_i32_0 = arith.constant 0 : i32
    %c0_i32_1 = arith.constant 0 : i32
    return %c0_i32, %c0_i32_0 : i32, i32
  }
  func.func @transform_2(%arg0: i32) -> (i32, i32) {
    %c0_i32 = arith.constant 0 : i32
    %c0_i32_0 = arith.constant 0 : i32
    %c0_i32_1 = arith.constant 0 : i32
    return %c0_i32, %c0_i32_0 : i32, i32
  }
  func.func @transform_3(%arg0: i32) -> (i32, i32) {
    %c0_i32 = arith.constant 0 : i32
    %c0_i32_0 = arith.constant 0 : i32
    %c0_i32_1 = arith.constant 0 : i32
    return %c0_i32, %c0_i32_0 : i32, i32
  }
}

</mosaic_0001>

<bundles_post_ra>
// kernel: mlp_cbn_single_dw_block.1
= control target key start
LH: loop header
LB: loop body
LE: loop exit
PB: predicated region body
PF: predicated region fallthrough
CT: control target
= control target key end

     0   :  { %v755_v6 = vmov 0   ;;  %v756_v22 = vmov 1   ;;  %s757_s17 = smov 1   ;;  %v758_v31 = vmov 8   ;;  %v759_v32 = vmov 9   ;;  %s764_s18 = smov 113   ;;  %s1035_s0 = inlined_call_operand.vmem [shape: f32[8,256], index: 0, kind: input, shape index: {}]   ;;  %s1036_s1 = inlined_call_operand.vmem [shape: f32[8,15], index: 1, kind: input, shape index: {}]   ;;  %s1037_s2 = inlined_call_operand.vmem [shape: f32[8,9], index: 2, kind: input, shape index: {}]   ;;  %s1038_s3 = inlined_call_operand.vmem [shape: f32[8,256], index: 3, kind: output, shape index: {}]  }
   0x1   :  { %v801_v0 = vld [vmem:[%s1035_s0] sm:$0xff]  ;;  %v806_v1 = vld [vmem:[%s1035_s0 + $0x8] sm:$0xff]  ;;  %710 = vset.pattern.permute.xlu1 %v755_v6  ;;  %711 = vset.pattern.permute.xlu0 %v756_v22  ;;  %v760_v33 = vmov 11   ;;  %v761_v34 = vmov 12   ;;  %v762_v35 = vmov 10   ;;  %s765_s19 = smov 15   ;;  %v18_v48 = vlaneseq }
   0x2   :  { %v27_v2 = vadd.f32 %v806_v1, %v801_v0  ;;  %v30_v3 = vmul.f32 %v801_v0, %v801_v0  ;;  %v31_v4 = vmul.f32 %v806_v1, %v806_v1  ;;  %v819_v25 = vld [vmem:[%s1036_s1] sm:$0xff]  ;;  %s763_s1 = smov 112   ;;  %v766_v42 = vmov 4   ;;  %s767_s20 = smov 127  }
   0x3   :  { %v768_v43 = vmov 6   ;;  %v769_v44 = vmov 7   ;;  %v770_v45 = vmov 13   ;;  %v771_v46 = vmov 14   ;;  %s772_s21 = smov 16   ;;  %s773_s22 = smov 2  }
   0x4   :  { %28 = vadd.xlane.f32.xlu0 %v27_v2  ;;  %v32_v5 = vadd.f32 %v31_v4, %v30_v3  ;;  %v862_v50 = vand.u32 127, %v18_v48  ;;  %vm649_vm14 = vcmask 1040384   ;;  %vm654_vm15 = vcmask 1041408  }
   0x6   :  { %v21_v51 = vand.u32 15, %v862_v50  ;;  %v20_v52 = vadd.s32 128, %v862_v50  ;;  %vm76_vm0 = vcmp.lt.s32.totalorder %v862_v50, 113  ;;  %vm83_vm1 = vcmp.lt.s32.totalorder %v862_v50, 1 }
   0x7   :  { %vm96_vm4 = vcmp.lt.s32.totalorder %v862_v50, 15  ;;  %vm103_vm5 = vcmp.lt.s32.totalorder %v862_v50, 127  ;;  %vm123_vm8 = vcmp.lt.s32.totalorder %v862_v50, 16  ;;  %vm182_vm9 = vcmp.lt.s32.totalorder %v862_v50, 112 }
   0x8   :  { %33 = vadd.xlane.f32.xlu0 %v32_v5  ;;  %vm23_vm2 = vcmp.eq.s32.totalorder %v21_v51, 0  ;;  %v22_v54 = vand.u32 15, %v20_v52  ;;  %vm25_vm6 = vcmp.eq.s32.totalorder %v21_v51, 15 }
   0xa   :  { %vm24_vm3 = vcmp.eq.s32.totalorder %v22_v54, 0  ;;  %vm26_vm7 = vcmp.eq.s32.totalorder %v22_v54, 15 }
  0x91   :  { %v29_v7 = vpop.xlane.xlu0 %28 }
  0x92   :  { %v35_v8 = vrot.slane %v29_v7, 4 }
  0x94   :  { %v36_v9 = vadd.f32 %v35_v8, %v29_v7 }
  0x95   :  { %v34_v10 = vpop.xlane.xlu0 %33 }
  0x96   :  { %v39_v11 = vmul.f32 0.001953125, %v36_v9  ;;  %v37_v12 = vrot.slane %v34_v10, 4 }
  0x98   :  { %v38_v13 = vadd.f32 %v37_v12, %v34_v10  ;;  %v41_v14 = vmul.f32 %v39_v11, %v39_v11 }
  0x9a   :  { %v40_v15 = vmul.f32 0.001953125, %v38_v13 }
  0x9c   :  { %v42_v16 = vsub.f32 %v40_v15, %v41_v14 }
  0x9e   :  { %v43_v17 = vmax.f32 %v42_v16, 0.0 }
  0xa0   :  { %v44_v18 = vadd.f32 1e-05, %v43_v17 }
  0xa2   :  { %735 = vrsqrt.f32 %v44_v18  ;;  %v46_v19 = vmul.f32 0.5, %v44_v18 }
  0xac   :  { %v736_v20 = vpop.eup %735 }
  0xad   :  { %v47_v21 = vmul.f32 %v736_v20, %v46_v19 }
  0xaf   :  { %v48_v23 = vmul.f32 %v736_v20, %v47_v21 }
  0xb1   :  { %v49_v24 = vsub.f32 1.5, %v48_v23 }
  0xb3   :  { %v50_v26 = vmul.f32 %v736_v20, %v49_v24 }
  0xb5   :  { %v51_v27 = vmul.f32 %v50_v26, %v819_v25 }
  0xb7   :  { %v52_v28 = vmul.f32 %v51_v27, %v39_v11 }
  0xb9   :  { %54 = vrot.lane.b32.xlu1 %v52_v28, %s757_s17 }
  0xbd   :  { %60 = vperm.xlu1 %710, %v51_v27  }
  0xc1   :  { %712 = vset.pattern.permute.xlu1 %v762_v35 }
 0x12b   :  { %v55_v29 = vpop.permute.xlu1 %54 }
 0x12c   :  { %v57_v30 = vsub.f32 %v819_v25, %v55_v29 }
 0x12e   :  { %67 = vperm.xlu0 %711, %v57_v30  }
 0x132   :  { %715 = vset.pattern.permute.xlu0 %v758_v31 }
 0x133   :  { %155 = vperm.xlu0 %715, %v819_v25  }
 0x137   :  { %716 = vset.pattern.permute.xlu0 %v759_v32 }
 0x138   :  { %163 = vperm.xlu0 %716, %v819_v25  }
 0x13c   :  { %717 = vset.pattern.permute.xlu0 %v760_v33  ;;  %v61_v36 = vpop.permute.xlu1 %60 }
 0x13d   :  { %171 = vperm.xlu0 %717, %v819_v25   ;;  %v63_v37 = vmul.f32 %v61_v36, %v801_v0  ;;  %v64_v40 = vmul.f32 %v61_v36, %v806_v1 }
 0x141   :  { %718 = vset.pattern.permute.xlu0 %v761_v34 }
 0x142   :  { %186 = vperm.xlu0 %718, %v819_v25  }
 0x146   :  { %721 = vset.pattern.permute.xlu0 %v766_v42 }
 0x1ad   :  { %v68_v38 = vpop.permute.xlu0 %67 }
 0x1ae   :  { %v830_v39 = vadd.f32 %v68_v38, %v63_v37  ;;  %v836_v41 = vadd.f32 %v68_v38, %v64_v40 }
 0x1b0   :  { %193 = vrot.lane.b32.xlu0 %v830_v39, %s763_s1  ;;  %72 = vrot.lane.b32.xlu1 %v830_v39, %s764_s18 }
 0x1b2   :  { %v156_v18 = vpop.permute.xlu0 %155 }
 0x1b4   :  { %74 = vrot.lane.b32.xlu1 %v836_v41, %s764_s18 }
 0x1b7   :  { %v164_v20 = vpop.permute.xlu0 %163 }
 0x1b8   :  { %79 = vrot.lane.b32.xlu1 %v830_v39, %s757_s17 }
 0x1bc   :  { %81 = vrot.lane.b32.xlu1 %v836_v41, %s757_s17  ;;  %v172_v23 = vpop.permute.xlu0 %171 }
 0x1c0   :  { %92 = vrot.lane.b32.xlu1 %v830_v39, %s765_s19 }
 0x1c1   :  { %v187_v28 = vpop.permute.xlu0 %186 }
 0x1c4   :  { %94 = vrot.lane.b32.xlu1 %v836_v41, %s765_s19 }
 0x1c8   :  { %99 = vrot.lane.b32.xlu1 %v830_v39, %s767_s20 }
 0x1cc   :  { %101 = vrot.lane.b32.xlu1 %v836_v41, %s767_s20 }
 0x1d0   :  { %114 = vperm.xlu1 %712, %v819_v25  }
 0x1d4   :  { %713 = vset.pattern.permute.xlu1 %v768_v43 }
 0x1d5   :  { %127 = vperm.xlu1 %713, %v819_v25  }
 0x1d9   :  { %714 = vset.pattern.permute.xlu1 %v769_v44 }
 0x1da   :  { %141 = vperm.xlu1 %714, %v819_v25  }
 0x1de   :  { %719 = vset.pattern.permute.xlu1 %v770_v45 }
 0x1df   :  { %200 = vperm.xlu1 %719, %v819_v25  }
 0x1e3   :  { %720 = vset.pattern.permute.xlu1 %v771_v46 }
 0x1e4   :  { %214 = vperm.xlu1 %720, %v819_v25  }
 0x1e8   :  { %134 = vrot.lane.b32.xlu1 %v830_v39, %s772_s21 }
 0x1ec   :  { %136 = vrot.lane.b32.xlu1 %v836_v41, %s772_s21 }
 0x1f0   :  { %195 = vrot.lane.b32.xlu1 %v836_v41, %s763_s1 }
 0x222   :  { %v73_v47 = vpop.permute.xlu1 %72  ;;  %v194_v40 = vpop.permute.xlu0 %193 }
 0x226   :  { %v75_v49 = vpop.permute.xlu1 %74 }
 0x227   :  { %v77_v56 = vsel %vm76_vm0, %v73_v47, %v75_v49  ;;  %v78_v61 = vsel %vm76_vm0, %v75_v49, %v73_v47  ;;  %vm659_vm0 = vcmask 1042432  }
 0x22a   :  { %v80_v53 = vpop.permute.xlu1 %79 }
 0x22e   :  { %v82_v55 = vpop.permute.xlu1 %81 }
 0x22f   :  { %v85_v57 = vsel %vm83_vm1, %v82_v55, %v80_v53  ;;  %v84_v59 = vsel %vm83_vm1, %v80_v53, %v82_v55  ;;  %vm670_vm1 = vcmask 1043456  }
 0x230   :  { %v868_v58 = vsel %vm23_vm2, %v77_v56, %v85_v57  ;;  %v91_v62 = vsel %vm24_vm3, %v78_v61, %v84_v59 }
 0x231   :  { %178 = vrot.lane.b32.xlu0 %v868_v58, %s763_s1  ;;  %119 = vrot.lane.b32.xlu1 %v868_v58, %s772_s21  ;;  %v166_v54 = vmul.f32 %v164_v20, %v868_v58  ;;  %v167_v55 = vmul.f32 %v164_v20, %v91_v62 }
 0x232   :  { %v93_v60 = vpop.permute.xlu1 %92 }
 0x235   :  { %121 = vrot.lane.b32.xlu1 %v91_v62, %s772_s21  ;;  %222 = vperm.xlu0 %721, %v819_v25  }
 0x236   :  { %v95_v63 = vpop.permute.xlu1 %94 }
 0x237   :  { %v98_v4 = vsel %vm96_vm4, %v95_v63, %v93_v60  ;;  %v97_v9 = vsel %vm96_vm4, %v93_v60, %v95_v63 }
 0x23a   :  { %v100_v2 = vpop.permute.xlu1 %99 }
 0x23e   :  { %v102_v3 = vpop.permute.xlu1 %101 }
 0x23f   :  { %v104_v5 = vsel %vm103_vm5, %v100_v2, %v102_v3  ;;  %v105_v8 = vsel %vm103_vm5, %v102_v3, %v100_v2 }
 0x240   :  { %v110_v7 = vsel %vm25_vm6, %v98_v4, %v104_v5  ;;  %v111_v10 = vsel %vm26_vm7, %v97_v9, %v105_v8 }
 0x241   :  { %148 = vrot.lane.b32.xlu1 %v110_v7, %s772_s21  ;;  %v174_v2 = vmul.f32 %v172_v23, %v110_v7  ;;  %v175_v3 = vmul.f32 %v172_v23, %v111_v10 }
 0x245   :  { %150 = vrot.lane.b32.xlu1 %v111_v10, %s772_s21 }
 0x249   :  { %180 = vrot.lane.b32.xlu1 %v91_v62, %s763_s1 }
 0x24d   :  { %207 = vrot.lane.b32.xlu1 %v110_v7, %s763_s1 }
 0x24f   :  { %v115_v11 = vpop.permute.xlu1 %114 }
 0x250   :  { %v117_v32 = vmul.f32 %v115_v11, %v830_v39  ;;  %v118_v33 = vmul.f32 %v115_v11, %v836_v41 }
 0x251   :  { %209 = vrot.lane.b32.xlu1 %v111_v10, %s763_s1 }
 0x254   :  { %v128_v12 = vpop.permute.xlu1 %127 }
 0x259   :  { %v142_v13 = vpop.permute.xlu1 %141 }
 0x25e   :  { %v201_v14 = vpop.permute.xlu1 %200 }
 0x263   :  { %v215_v15 = vpop.permute.xlu1 %214 }
 0x267   :  { %v135_v16 = vpop.permute.xlu1 %134 }
 0x26b   :  { %v137_v17 = vpop.permute.xlu1 %136 }
 0x26c   :  { %v138_v35 = vsel %vm123_vm8, %v135_v16, %v137_v17  ;;  %v139_v36 = vsel %vm123_vm8, %v137_v17, %v135_v16 }
 0x26d   :  { %v144_v45 = vmul.f32 %v142_v13, %v139_v36  ;;  %v145_v46 = vmul.f32 %v142_v13, %v138_v35 }
 0x26f   :  { %v196_v19 = vpop.permute.xlu1 %195 }
 0x270   :  { %v197_v62 = vsel %vm182_vm9, %v194_v40, %v196_v19  ;;  %v198_v13 = vsel %vm182_vm9, %v196_v19, %v194_v40 }
 0x271   :  { %v204_v20 = vmul.f32 %v201_v14, %v198_v13 }
 0x2a3   :  { %v120_v21 = vpop.permute.xlu1 %119  ;;  %v179_v56 = vpop.permute.xlu0 %178 }
 0x2a7   :  { %v122_v24 = vpop.permute.xlu1 %121 }
 0x2a8   :  { %v124_v26 = vsel %vm123_vm8, %v120_v21, %v122_v24  ;;  %v125_v27 = vsel %vm123_vm8, %v122_v24, %v120_v21 }
 0x2a9   :  { %v130_v29 = vmul.f32 %v128_v12, %v125_v27  ;;  %v131_v30 = vmul.f32 %v128_v12, %v124_v26 }
 0x2ab   :  { %v132_v37 = vadd.f32 %v130_v29, %v117_v32  ;;  %v133_v38 = vadd.f32 %v131_v30, %v118_v33 }
 0x2ad   :  { %v146_v41 = vadd.f32 %v144_v45, %v132_v37  ;;  %v147_v51 = vadd.f32 %v145_v46, %v133_v38 }
 0x2b3   :  { %v149_v34 = vpop.permute.xlu1 %148 }
 0x2b7   :  { %v151_v47 = vpop.permute.xlu1 %150 }
 0x2b8   :  { %v152_v49 = vsel %vm123_vm8, %v149_v34, %v151_v47  ;;  %v153_v39 = vsel %vm123_vm8, %v151_v47, %v149_v34 }
 0x2b9   :  { %v158_v52 = vmul.f32 %v156_v18, %v153_v39  ;;  %v159_v53 = vmul.f32 %v156_v18, %v152_v49  ;;  %v203_v18 = vmul.f32 %v201_v14, %v197_v62 }
 0x2bb   :  { %v160_v57 = vadd.f32 %v158_v52, %v146_v41  ;;  %v161_v59 = vadd.f32 %v159_v53, %v147_v51  ;;  %v181_v60 = vpop.permute.xlu1 %180  ;;  %v774_v51 = vmov 2  }
 0x2bc   :  { %v183_v61 = vsel %vm182_vm9, %v179_v56, %v181_v60  ;;  %v184_v63 = vsel %vm182_vm9, %v181_v60, %v179_v56  ;;  %722 = vset.pattern.permute.xlu1 %v774_v51 }
 0x2bd   :  { %v168_v4 = vadd.f32 %v166_v54, %v160_v57  ;;  %v169_v5 = vadd.f32 %v167_v55, %v161_v59  ;;  %v189_v11 = vmul.f32 %v187_v28, %v183_v61  ;;  %v190_v12 = vmul.f32 %v187_v28, %v184_v63  ;;  %v223_v28 = vpop.permute.xlu0 %222 }
 0x2be   :  { %v775_v59 = vmov 3  }
 0x2bf   :  { %v176_v8 = vadd.f32 %v174_v2, %v168_v4  ;;  %v177_v9 = vadd.f32 %v175_v3, %v169_v5  ;;  %v208_v58 = vpop.permute.xlu1 %207  ;;  %725 = vset.pattern.permute.xlu0 %v775_v59  ;;  %v17_v3 = vld [vmem:[%s1037_s2] sm:$0xff]  ;;  %v776_v4 = vmov 5  }
 0x2c1   :  { %v191_v16 = vadd.f32 %v189_v11, %v176_v8  ;;  %v192_v17 = vadd.f32 %v190_v12, %v177_v9 }
 0x2c3   :  { %v210_v21 = vpop.permute.xlu1 %209  ;;  %v205_v26 = vadd.f32 %v203_v18, %v191_v16  ;;  %v206_v27 = vadd.f32 %v204_v20, %v192_v17 }
 0x2c4   :  { %v211_v7 = vsel %vm182_vm9, %v208_v58, %v210_v21  ;;  %v212_v10 = vsel %vm182_vm9, %v210_v21, %v208_v58 }
 0x2c5   :  { %v217_v23 = vmul.f32 %v215_v15, %v211_v7  ;;  %v218_v24 = vmul.f32 %v215_v15, %v212_v10 }
 0x2c7   :  { %v219_v29 = vadd.f32 %v217_v23, %v205_v26  ;;  %v220_v30 = vadd.f32 %v218_v24, %v206_v27 }
 0x2c9   :  { %v225_v32 = vadd.f32 %v223_v28, %v219_v29  ;;  %v226_v19 = vadd.f32 %v223_v28, %v220_v30 }
 0x2cb   :  { %v913_v33 = vadd.f32 %v225_v32, %v801_v0  ;;  %v916_v14 = vadd.f32 %v226_v19, %v806_v1 }
 0x2cd   :  { %v229_v34 = vadd.f32 %v916_v14, %v913_v33  ;;  %v232_v50 = vmul.f32 %v913_v33, %v913_v33  ;;  %v233_v15 = vmul.f32 %v916_v14, %v916_v14 }
 0x2cf   :  { %230 = vadd.xlane.f32.xlu0 %v229_v34  ;;  %v234_v35 = vadd.f32 %v233_v15, %v232_v50 }
 0x2d1   :  { %235 = vadd.xlane.f32.xlu1 %v234_v35 }
 0x35c   :  { %v231_v36 = vpop.xlane.xlu0 %230 }
 0x35d   :  { %v237_v37 = vrot.slane %v231_v36, 4 }
 0x35e   :  { %v236_v38 = vpop.xlane.xlu1 %235 }
 0x35f   :  { %v238_v0 = vadd.f32 %v237_v37, %v231_v36  ;;  %v239_v40 = vrot.slane %v236_v38, 4 }
 0x361   :  { %v241_v45 = vmul.f32 0.001953125, %v238_v0  ;;  %v240_v1 = vadd.f32 %v239_v40, %v236_v38 }
 0x363   :  { %v243_v46 = vmul.f32 %v241_v45, %v241_v45  ;;  %v242_v47 = vmul.f32 0.001953125, %v240_v1  ;;  %259 = vrot.lane.b32.xlu1 %v241_v45, %s773_s22 }
 0x365   :  { %v244_v49 = vsub.f32 %v242_v47, %v243_v46 }
 0x367   :  { %v245_v39 = vmax.f32 %v244_v49, 0.0 }
 0x369   :  { %v246_v41 = vadd.f32 1e-05, %v245_v39 }
 0x36b   :  { %737 = vrsqrt.f32 %v246_v41  ;;  %v248_v52 = vmul.f32 0.5, %v246_v41 }
 0x375   :  { %v738_v53 = vpop.eup %737 }
 0x376   :  { %v249_v54 = vmul.f32 %v738_v53, %v248_v52 }
 0x378   :  { %v250_v55 = vmul.f32 %v738_v53, %v249_v54 }
 0x37a   :  { %v251_v56 = vsub.f32 1.5, %v250_v55 }
 0x37c   :  { %v252_v57 = vmul.f32 %v738_v53, %v251_v56 }
 0x37e   :  { %254 = vrot.lane.b32.xlu0 %v252_v57, %s773_s22 }
 0x3d5   :  { %v260_v63 = vpop.permute.xlu1 %259 }
 0x3f0   :  { %v255_v60 = vpop.permute.xlu0 %254 }
 0x3f1   :  { %v257_v61 = vmul.f32 %v255_v60, %v819_v25 }
 0x3f3   :  { %v262_v2 = vmul.f32 %v260_v63, %v257_v61  ;;  %270 = vperm.xlu1 %722, %v257_v61  }
 0x3f5   :  { %264 = vrot.lane.b32.xlu0 %v262_v2, %s757_s17 }
 0x3f7   :  { %723 = vset.pattern.permute.xlu1 %v755_v6 }
 0x3f8   :  { %290 = vperm.xlu1 %723, %v17_v3  }
 0x3fc   :  { %724 = vset.pattern.permute.xlu1 %v766_v42 }
 0x3fd   :  { %314 = vperm.xlu1 %724, %v17_v3  }
 0x401   :  { %727 = vset.pattern.permute.xlu1 %v774_v51 }
 0x402   :  { %350 = vperm.xlu1 %727, %v17_v3  }
 0x406   :  { %728 = vset.pattern.permute.xlu1 %v775_v59 }
 0x407   :  { %378 = vperm.xlu1 %728, %v17_v3  }
 0x40b   :  { %730 = vset.pattern.permute.xlu1 %v768_v43 }
 0x40c   :  { %554 = vperm.xlu1 %730, %v17_v3  }
 0x410   :  { %731 = vset.pattern.permute.xlu1 %v769_v44  ;;  %v294_v44 = vshrl.u32 %v18_v48, 7 }
 0x411   :  { %586 = vperm.xlu1 %731, %v17_v3  }
 0x412   :  { %v295_v12 = vsub.s32 0, %v294_v44  ;;  %v327_v62 = vsub.s32 1, %v294_v44  ;;  %v383_v17 = vsub.s32 3, %v294_v44  ;;  %v355_v10 = vsub.s32 2, %v294_v44 }
 0x415   :  { %733 = vset.pattern.permute.xlu1 %v776_v4 }
 0x416   :  { %674 = vperm.xlu1 %733, %v819_v25  }
 0x467   :  { %v265_v5 = vpop.permute.xlu0 %264 }
 0x468   :  { %v267_v6 = vsub.f32 %v819_v25, %v265_v5 }
 0x46a   :  { %277 = vperm.xlu0 %725, %v267_v6  }
 0x46e   :  { %726 = vset.pattern.permute.xlu0 %v756_v22 }
 0x46f   :  { %322 = vperm.xlu0 %726, %v17_v3  }
 0x472   :  { %v271_v42 = vpop.permute.xlu1 %270 }
 0x473   :  { %729 = vset.pattern.permute.xlu0 %v776_v4  ;;  %v273_v9 = vmul.f32 %v271_v42, %v913_v33  ;;  %v274_v11 = vmul.f32 %v271_v42, %v916_v14 }
 0x474   :  { %522 = vperm.xlu0 %729, %v17_v3  }
 0x477   :  { %v291_v43 = vpop.permute.xlu1 %290 }
 0x478   :  { %732 = vset.pattern.permute.xlu0 %v758_v31 }
 0x479   :  { %618 = vperm.xlu0 %732, %v17_v3  }
 0x47c   :  { %v315_v8 = vpop.permute.xlu1 %314 }
 0x47d   :  { %734 = vset.pattern.permute.xlu0 %v776_v4 }
 0x481   :  { %v351_v31 = vpop.permute.xlu1 %350 }
 0x486   :  { %v379_v0 = vpop.permute.xlu1 %378 }
 0x4e9   :  { %v278_v25 = vpop.permute.xlu0 %277 }
 0x4ea   :  { %v280_v58 = vadd.f32 %v278_v25, %v273_v9  ;;  %v281_v22 = vadd.f32 %v278_v25, %v274_v11 }
 0x4ec   :  { %v284_v13 = vrot.slane %v280_v58, 4  ;;  %v285_v16 = vrot.slane %v281_v22, 4  ;;  %v296_v18 = vrot.slane %v280_v58, %v295_v12  ;;  %v300_v20 = vrot.slane %v281_v22, %v295_v12 }
 0x4ed   :  { %v328_v21 = vrot.slane %v280_v58, %v327_v62  ;;  %v332_v7 = vrot.slane %v281_v22, %v327_v62  ;;  %v384_v27 = vrot.slane %v280_v58, %v383_v17  ;;  %v388_v28 = vrot.slane %v281_v22, %v383_v17 }
 0x4ee   :  { %v304_v48 = vrot.slane %v284_v13, %v295_v12  ;;  %v308_v23 = vrot.slane %v285_v16, %v295_v12  ;;  %v309_v24 = vmul.f32 %v296_v18, %v291_v43  ;;  %v310_v26 = vmul.f32 %v300_v20, %v291_v43  ;;  %v323_v32 = vpop.permute.xlu0 %322 }
 0x4ef   :  { %v336_v29 = vrot.slane %v284_v13, %v327_v62  ;;  %v340_v30 = vrot.slane %v285_v16, %v327_v62  ;;  %v356_v35 = vrot.slane %v280_v58, %v355_v10  ;;  %v360_v36 = vrot.slane %v281_v22, %v355_v10 }
 0x4f0   :  { %v311_v19 = vmul.f32 %v304_v48, %v291_v43  ;;  %v312_v34 = vmul.f32 %v308_v23, %v291_v43  ;;  %v317_v50 = vadd.f32 %v315_v8, %v309_v24  ;;  %v318_v15 = vadd.f32 %v315_v8, %v310_v26 }
 0x4f1   :  { %v364_v37 = vrot.slane %v284_v13, %v355_v10  ;;  %v368_v38 = vrot.slane %v285_v16, %v355_v10  ;;  %v341_v1 = vmul.f32 %v328_v21, %v323_v32  ;;  %v342_v46 = vmul.f32 %v332_v7, %v323_v32 }
 0x4f2   :  { %v319_v40 = vadd.f32 %v315_v8, %v311_v19  ;;  %v320_v45 = vadd.f32 %v315_v8, %v312_v34  ;;  %v392_v47 = vrot.slane %v284_v13, %v383_v17  ;;  %v396_v49 = vrot.slane %v285_v16, %v383_v17 }
 0x4f3   :  { %v369_v39 = vmul.f32 %v356_v35, %v351_v31  ;;  %v370_v41 = vmul.f32 %v360_v36, %v351_v31  ;;  %v343_v51 = vmul.f32 %v336_v29, %v323_v32  ;;  %v344_v52 = vmul.f32 %v340_v30, %v323_v32 }
 0x4f4   :  { %v345_v53 = vadd.f32 %v341_v1, %v317_v50  ;;  %v346_v54 = vadd.f32 %v342_v46, %v318_v15  ;;  %v397_v55 = vmul.f32 %v384_v27, %v379_v0  ;;  %v398_v56 = vmul.f32 %v388_v28, %v379_v0 }
 0x4f5   :  { %v371_v57 = vmul.f32 %v364_v37, %v351_v31  ;;  %v372_v59 = vmul.f32 %v368_v38, %v351_v31  ;;  %v347_v60 = vadd.f32 %v343_v51, %v319_v40  ;;  %v348_v61 = vadd.f32 %v344_v52, %v320_v45 }
 0x4f6   :  { %v373_v63 = vadd.f32 %v369_v39, %v345_v53  ;;  %v374_v2 = vadd.f32 %v370_v41, %v346_v54  ;;  %v399_v3 = vmul.f32 %v392_v47, %v379_v0  ;;  %v400_v4 = vmul.f32 %v396_v49, %v379_v0 }
 0x4f7   :  { %v375_v5 = vadd.f32 %v371_v57, %v347_v60  ;;  %v376_v6 = vadd.f32 %v372_v59, %v348_v61 }
 0x4f8   :  { %v940_v42 = vadd.f32 %v397_v55, %v373_v63  ;;  %v942_v43 = vadd.f32 %v398_v56, %v374_v2 }
 0x4f9   :  { %v944_v44 = vadd.f32 %v399_v3, %v375_v5  ;;  %v946_v8 = vadd.f32 %v400_v4, %v376_v6 }
 0x4fa   :  { %v949_v9 = vmul.f32 0.70710677, %v940_v42  ;;  %v952_v11 = vmul.f32 0.70710677, %v942_v43 }
 0x4fb   :  { %v955_v25 = vmul.f32 0.70710677, %v944_v44  ;;  %v958_v12 = vmul.f32 0.70710677, %v946_v8 }
 0x4fc   :  { %v421_v58 = vand.u32 2147483647, %v949_v9  ;;  %v422_v22 = vand.u32 2147483647, %v952_v11  ;;  %vm413_vm10 = vcmp.ge.f32.partialorder %v949_v9, 0.0  ;;  %vm414_vm11 = vcmp.ge.f32.partialorder %v952_v11, 0.0 }
 0x4fd   :  { %v423_v62 = vand.u32 2147483647, %v955_v25  ;;  %v424_v13 = vand.u32 2147483647, %v958_v12  ;;  %vm415_vm12 = vcmp.ge.f32.partialorder %v955_v25, 0.0  ;;  %vm416_vm13 = vcmp.ge.f32.partialorder %v958_v12, 0.0 }
 0x4fe   :  { %v425_v16 = vmul.f32 0.3275911, %v421_v58  ;;  %v426_v17 = vmul.f32 0.3275911, %v422_v22  ;;  %v485_v28 = vsub.f32 0.0, %v421_v58  ;;  %v486_v19 = vsub.f32 0.0, %v422_v22 }
 0x4ff   :  { %v427_v31 = vmul.f32 0.3275911, %v423_v62  ;;  %v428_v18 = vmul.f32 0.3275911, %v424_v13  ;;  %v487_v15 = vsub.f32 0.0, %v423_v62  ;;  %v488_v37 = vsub.f32 0.0, %v424_v13 }
 0x500   :  { %v429_v20 = vadd.f32 1.0, %v425_v16  ;;  %v430_v21 = vadd.f32 1.0, %v426_v17  ;;  %v489_v40 = vmul.f32 %v485_v28, %v421_v58  ;;  %v490_v1 = vmul.f32 %v486_v19, %v422_v22 }
 0x501   :  { %v431_v7 = vadd.f32 1.0, %v427_v31  ;;  %v432_v10 = vadd.f32 1.0, %v428_v18  ;;  %v491_v49 = vmul.f32 %v487_v15, %v423_v62  ;;  %v492_v41 = vmul.f32 %v488_v37, %v424_v13 }
 0x502   :  { %739 = vrcp.f32 %v429_v20  ;;  %v493_v53 = vmul.f32 1.442695, %v489_v40  ;;  %v495_v56 = vmul.f32 1.442695, %v490_v1  ;;  %v406_v25 = vmul.f32 0.5, %v942_v43 }
 0x503   :  { %741 = vrcp.f32 %v430_v21  ;;  %v497_v60 = vmul.f32 1.442695, %v491_v49  ;;  %v499_v2 = vmul.f32 1.442695, %v492_v41 }
 0x504   :  { %743 = vrcp.f32 %v431_v7 }
 0x505   :  { %745 = vrcp.f32 %v432_v10 }
 0x506   :  { %747 = vpow2.f32 %v493_v53 }
 0x507   :  { %749 = vpow2.f32 %v495_v56 }
 0x508   :  { %751 = vpow2.f32 %v497_v60 }
 0x509   :  { %753 = vpow2.f32 %v499_v2 }
 0x50c   :  { %v740_v48 = vpop.eup %739 }
 0x50d   :  { %v742_v23 = vpop.eup %741  ;;  %v437_v24 = vmul.f32 %v740_v48, %v429_v20 }
 0x50e   :  { %v744_v26 = vpop.eup %743  ;;  %v438_v27 = vmul.f32 %v742_v23, %v430_v21 }
 0x50f   :  { %v746_v29 = vpop.eup %745  ;;  %v439_v30 = vmul.f32 %v744_v26, %v431_v7  ;;  %v441_v32 = vsub.f32 2.0, %v437_v24 }
 0x510   :  { %v440_v34 = vmul.f32 %v746_v29, %v432_v10  ;;  %v442_v50 = vsub.f32 2.0, %v438_v27 }
 0x511   :  { %v443_v35 = vsub.f32 2.0, %v439_v30  ;;  %v445_v36 = vmul.f32 %v740_v48, %v441_v32 }
 0x512   :  { %v444_v38 = vsub.f32 2.0, %v440_v34  ;;  %v446_v0 = vmul.f32 %v742_v23, %v442_v50 }
 0x513   :  { %v447_v45 = vmul.f32 %v744_v26, %v443_v35  ;;  %v449_v46 = vmul.f32 1.0614054, %v445_v36  ;;  %v555_v35 = vpop.permute.xlu1 %554 }
 0x514   :  { %v448_v47 = vmul.f32 %v746_v29, %v444_v38  ;;  %v450_v39 = vmul.f32 1.0614054, %v446_v0  ;;  %v748_v29 = vpop.eup %747 }
 0x515   :  { %v451_v51 = vmul.f32 1.0614054, %v447_v45  ;;  %v453_v52 = vadd.f32 -1.4531521, %v449_v46  ;;  %v750_v19 = vpop.eup %749 }
 0x516   :  { %v452_v54 = vmul.f32 1.0614054, %v448_v47  ;;  %v454_v55 = vadd.f32 -1.4531521, %v450_v39  ;;  %v752_v15 = vpop.eup %751 }
 0x517   :  { %v455_v57 = vadd.f32 -1.4531521, %v451_v51  ;;  %v457_v59 = vmul.f32 %v453_v52, %v445_v36  ;;  %v754_v40 = vpop.eup %753  ;;  %v970_v12 = vpop.permute.xlu1 %586 }
 0x518   :  { %v456_v61 = vadd.f32 -1.4531521, %v452_v54  ;;  %v458_v63 = vmul.f32 %v454_v55, %v446_v0 }
 0x519   :  { %v459_v3 = vmul.f32 %v455_v57, %v447_v45  ;;  %v461_v4 = vadd.f32 1.4214138, %v457_v59  ;;  %v407_v59 = vmul.f32 0.5, %v944_v44 }
 0x51a   :  { %v460_v5 = vmul.f32 %v456_v61, %v448_v47  ;;  %v462_v6 = vadd.f32 1.4214138, %v458_v63  ;;  %v408_v63 = vmul.f32 0.5, %v946_v8 }
 0x51b   :  { %v463_v58 = vadd.f32 1.4214138, %v459_v3  ;;  %v465_v22 = vmul.f32 %v461_v4, %v445_v36 }
 0x51c   :  { %v464_v62 = vadd.f32 1.4214138, %v460_v5  ;;  %v466_v13 = vmul.f32 %v462_v6, %v446_v0 }
 0x51d   :  { %v467_v16 = vmul.f32 %v463_v58, %v447_v45  ;;  %v469_v17 = vadd.f32 -0.28449672, %v465_v22 }
 0x51e   :  { %v468_v31 = vmul.f32 %v464_v62, %v448_v47  ;;  %v470_v18 = vadd.f32 -0.28449672, %v466_v13 }
 0x51f   :  { %v471_v20 = vadd.f32 -0.28449672, %v467_v16  ;;  %v473_v21 = vmul.f32 %v469_v17, %v445_v36 }
 0x520   :  { %v472_v7 = vadd.f32 -0.28449672, %v468_v31  ;;  %v474_v10 = vmul.f32 %v470_v18, %v446_v0 }
 0x521   :  { %v475_v48 = vmul.f32 %v471_v20, %v447_v45  ;;  %v477_v23 = vadd.f32 0.2548296, %v473_v21 }
 0x522   :  { %v476_v24 = vmul.f32 %v472_v7, %v448_v47  ;;  %v478_v26 = vadd.f32 0.2548296, %v474_v10 }
 0x523   :  { %v479_v27 = vadd.f32 0.2548296, %v475_v48  ;;  %v481_v28 = vmul.f32 %v477_v23, %v445_v36  ;;  %v777_v36 = vmov -1.0  }
 0x524   :  { %v480_v30 = vadd.f32 0.2548296, %v476_v24  ;;  %v482_v32 = vmul.f32 %v478_v26, %v446_v0  ;;  %v417_v0 = vsel %vm413_vm10, 1.0, %v777_v36  ;;  %v418_v9 = vsel %vm414_vm11, 1.0, %v777_v36 }
 0x525   :  { %v483_v34 = vmul.f32 %v479_v27, %v447_v45  ;;  %v501_v50 = vmul.f32 %v748_v29, %v481_v28  ;;  %v419_v51 = vsel %vm415_vm12, 1.0, %v777_v36  ;;  %v420_v53 = vsel %vm416_vm13, 1.0, %v777_v36 }
 0x526   :  { %v484_v37 = vmul.f32 %v480_v30, %v448_v47  ;;  %v502_v38 = vmul.f32 %v750_v19, %v482_v32  ;;  %v405_v47 = vmul.f32 0.5, %v940_v42  ;;  %v523_v42 = vpop.permute.xlu0 %522 }
 0x527   :  { %v503_v1 = vmul.f32 %v752_v15, %v483_v34  ;;  %v505_v46 = vsub.f32 1.0, %v501_v50 }
 0x528   :  { %v504_v49 = vmul.f32 %v754_v40, %v484_v37  ;;  %v506_v39 = vsub.f32 1.0, %v502_v38 }
 0x529   :  { %v507_v45 = vsub.f32 1.0, %v503_v1  ;;  %v509_v41 = vmul.f32 %v505_v46, %v417_v0 }
 0x52a   :  { %v508_v52 = vsub.f32 1.0, %v504_v49  ;;  %v510_v11 = vmul.f32 %v506_v39, %v418_v9 }
 0x52b   :  { %v511_v54 = vmul.f32 %v507_v45, %v419_v51  ;;  %v513_v55 = vadd.f32 1.0, %v509_v41 }
 0x52c   :  { %v512_v56 = vmul.f32 %v508_v52, %v420_v53  ;;  %v514_v57 = vadd.f32 1.0, %v510_v11 }
 0x52d   :  { %v515_v60 = vadd.f32 1.0, %v511_v54  ;;  %v973_v61 = vmul.f32 %v513_v55, %v405_v47 }
 0x52e   :  { %v516_v2 = vadd.f32 1.0, %v512_v56  ;;  %v976_v3 = vmul.f32 %v514_v57, %v406_v25 }
 0x52f   :  { %v978_v4 = vmul.f32 %v515_v60, %v407_v59  ;;  %v557_v5 = vmul.f32 %v555_v35, %v973_v61  ;;  %v525_v43 = vmul.f32 %v523_v42, %v973_v61  ;;  %v984_v6 = vmul.f32 %v970_v12, %v973_v61 }
 0x530   :  { %v986_v44 = vmul.f32 %v516_v2, %v408_v63  ;;  %v558_v58 = vmul.f32 %v555_v35, %v976_v3  ;;  %v526_v8 = vmul.f32 %v523_v42, %v976_v3  ;;  %v992_v22 = vmul.f32 %v970_v12, %v976_v3  ;;  %v619_v63 = vpop.permute.xlu0 %618 }
 0x531   :  { %v559_v62 = vmul.f32 %v555_v35, %v978_v4  ;;  %v561_v13 = vrot.slane %v557_v5, 4  ;;  %v527_v16 = vmul.f32 %v523_v42, %v978_v4  ;;  %v529_v17 = vrot.slane %v525_v43, 4 }
 0x532   :  { %v560_v31 = vmul.f32 %v555_v35, %v986_v44  ;;  %v567_v18 = vrot.slane %v558_v58, 4  ;;  %v528_v20 = vmul.f32 %v523_v42, %v986_v44  ;;  %v535_v21 = vrot.slane %v526_v8, 4 }
 0x533   :  { %v562_v7 = vadd.f32 %v561_v13, %v557_v5  ;;  %v573_v10 = vrot.slane %v559_v62, 4  ;;  %v530_v48 = vadd.f32 %v529_v17, %v525_v43  ;;  %v541_v23 = vrot.slane %v527_v16, 4 }
 0x534   :  { %v568_v24 = vadd.f32 %v567_v18, %v558_v58  ;;  %v579_v26 = vrot.slane %v560_v31, 4  ;;  %v536_v27 = vadd.f32 %v535_v21, %v526_v8  ;;  %v547_v28 = vrot.slane %v528_v20, 4 }
 0x535   :  { %v563_v29 = vrot.slane %v562_v7, 2  ;;  %v574_v30 = vadd.f32 %v573_v10, %v559_v62  ;;  %v531_v32 = vrot.slane %v530_v48, 2  ;;  %v542_v19 = vadd.f32 %v541_v23, %v527_v16 }
 0x536   :  { %v569_v34 = vrot.slane %v568_v24, 2  ;;  %v580_v50 = vadd.f32 %v579_v26, %v560_v31  ;;  %v537_v15 = vrot.slane %v536_v27, 2  ;;  %v548_v35 = vadd.f32 %v547_v28, %v528_v20 }
 0x537   :  { %v564_v37 = vadd.f32 %v563_v29, %v562_v7  ;;  %v575_v38 = vrot.slane %v574_v30, 2  ;;  %v532_v40 = vadd.f32 %v531_v32, %v530_v48  ;;  %v543_v1 = vrot.slane %v542_v19, 2 }
 0x538   :  { %v570_v46 = vadd.f32 %v569_v34, %v568_v24  ;;  %v581_v36 = vrot.slane %v580_v50, 2  ;;  %v538_v0 = vadd.f32 %v537_v15, %v536_v27  ;;  %v549_v49 = vrot.slane %v548_v35, 2 }
 0x539   :  { %v565_v39 = vrot.slane %v564_v37, 1  ;;  %v576_v9 = vadd.f32 %v575_v38, %v574_v30  ;;  %v533_v45 = vrot.slane %v532_v40, 1  ;;  %v544_v41 = vadd.f32 %v543_v1, %v542_v19 }
 0x53a   :  { %v571_v51 = vrot.slane %v570_v46, 1  ;;  %v582_v52 = vadd.f32 %v581_v36, %v580_v50  ;;  %v539_v11 = vrot.slane %v538_v0, 1  ;;  %v550_v47 = vadd.f32 %v549_v49, %v548_v35 }
 0x53b   :  { %v998_v53 = vadd.f32 %v565_v39, %v564_v37  ;;  %v577_v54 = vrot.slane %v576_v9, 1  ;;  %v1000_v55 = vadd.f32 %v533_v45, %v532_v40  ;;  %v545_v25 = vrot.slane %v544_v41, 1 }
 0x53c   :  { %v1002_v56 = vadd.f32 %v571_v51, %v570_v46  ;;  %v583_v57 = vrot.slane %v582_v52, 1  ;;  %v540_v59 = vadd.f32 %v539_v11, %v538_v0  ;;  %v551_v60 = vrot.slane %v550_v47, 1 }
 0x53d   :  { %v578_v2 = vadd.f32 %v577_v54, %v576_v9  ;;  %v546_v42 = vadd.f32 %v545_v25, %v544_v41  ;;  %v591_v5 = vmul.f32 %v970_v12, %v978_v4  ;;  %v592_v43 = vmul.f32 %v970_v12, %v986_v44 }
 0x53e   :  { %v584_v58 = vadd.f32 %v583_v57, %v582_v52  ;;  %v552_v8 = vadd.f32 %v551_v60, %v550_v47  ;;  %v593_v62 = vrot.slane %v984_v6, 4  ;;  %v599_v13 = vrot.slane %v992_v22, 4 }
 0x53f   :  { %v605_v16 = vrot.slane %v591_v5, 4  ;;  %v611_v17 = vrot.slane %v592_v43, 4  ;;  %v621_v31 = vmul.f32 %v619_v63, %v973_v61  ;;  %v622_v18 = vmul.f32 %v619_v63, %v976_v3 }
 0x540   :  { %v594_v20 = vadd.f32 %v593_v62, %v984_v6  ;;  %v600_v21 = vadd.f32 %v599_v13, %v992_v22  ;;  %v623_v7 = vmul.f32 %v619_v63, %v978_v4  ;;  %v624_v12 = vmul.f32 %v619_v63, %v986_v44 }
 0x541   :  { %v606_v10 = vadd.f32 %v605_v16, %v591_v5  ;;  %v612_v48 = vadd.f32 %v611_v17, %v592_v43  ;;  %v625_v23 = vrot.slane %v621_v31, 4  ;;  %v631_v24 = vrot.slane %v622_v18, 4 }
 0x542   :  { %v595_v26 = vrot.slane %v594_v20, 2  ;;  %v601_v27 = vrot.slane %v600_v21, 2  ;;  %v637_v28 = vrot.slane %v623_v7, 4  ;;  %v643_v29 = vrot.slane %v624_v12, 4 }
 0x543   :  { %v607_v61 = vrot.slane %v606_v10, 2  ;;  %v613_v3 = vrot.slane %v612_v48, 2  ;;  %v626_v30 = vadd.f32 %v625_v23, %v621_v31  ;;  %v632_v32 = vadd.f32 %v631_v24, %v622_v18 }
 0x544   :  { %v596_v6 = vadd.f32 %v595_v26, %v594_v20  ;;  %v602_v19 = vadd.f32 %v601_v27, %v600_v21  ;;  %v638_v22 = vadd.f32 %v637_v28, %v623_v7  ;;  %v644_v34 = vadd.f32 %v643_v29, %v624_v12 }
 0x545   :  { %v608_v4 = vadd.f32 %v607_v61, %v606_v10  ;;  %v614_v50 = vadd.f32 %v613_v3, %v612_v48  ;;  %v627_v44 = vrot.slane %v626_v30, 2  ;;  %v633_v15 = vrot.slane %v632_v32, 2 }
 0x546   :  { %v597_v35 = vrot.slane %v596_v6, 1  ;;  %v603_v37 = vrot.slane %v602_v19, 1  ;;  %v639_v38 = vrot.slane %v638_v22, 2  ;;  %v645_v40 = vrot.slane %v644_v34, 2 }
 0x547   :  { %v609_v1 = vrot.slane %v608_v4, 1  ;;  %v615_v46 = vrot.slane %v614_v50, 1  ;;  %v628_v36 = vadd.f32 %v627_v44, %v626_v30  ;;  %v634_v0 = vadd.f32 %v633_v15, %v632_v32 }
 0x548   :  { %v640_v49 = vadd.f32 %v639_v38, %v638_v22  ;;  %v646_v39 = vadd.f32 %v645_v40, %v644_v34  ;;  %v598_v9 = vadd.f32 %v597_v35, %v596_v6  ;;  %v604_v45 = vadd.f32 %v603_v37, %v602_v19 }
 0x549   :  { %v610_v41 = vadd.f32 %v609_v1, %v608_v4  ;;  %v616_v51 = vadd.f32 %v615_v46, %v614_v50  ;;  %v629_v52 = vrot.slane %v628_v36, 1  ;;  %v635_v11 = vrot.slane %v634_v0, 1 }
 0x54a   :  { %v641_v47 = vrot.slane %v640_v49, 1  ;;  %v647_v54 = vrot.slane %v646_v39, 1  ;;  %v650_v25 = vsel %vm649_vm14, %v1000_v55, %v998_v53  ;;  %v651_v57 = vsel %vm649_vm14, %v540_v59, %v1002_v56  ;;  %v675_v59 = vpop.permute.xlu1 %674 }
 0x54b   :  { %v652_v60 = vsel %vm649_vm14, %v546_v42, %v578_v2  ;;  %v653_v63 = vsel %vm649_vm14, %v552_v8, %v584_v58  ;;  %v655_v62 = vsel %vm654_vm15, %v650_v25, %v598_v9  ;;  %v656_v13 = vsel %vm654_vm15, %v651_v57, %v604_v45 }
 0x54c   :  { %v642_v5 = vadd.f32 %v641_v47, %v640_v49  ;;  %v648_v43 = vadd.f32 %v647_v54, %v646_v39  ;;  %v657_v16 = vsel %vm654_vm15, %v652_v60, %v610_v41  ;;  %v658_v17 = vsel %vm654_vm15, %v653_v63, %v616_v51 }
 0x54d   :  { %v630_v53 = vadd.f32 %v629_v52, %v628_v36  ;;  %v636_v55 = vadd.f32 %v635_v11, %v634_v0 }
 0x54e   :  { %v662_v31 = vsel %vm659_vm0, %v657_v16, %v642_v5  ;;  %v663_v56 = vsel %vm659_vm0, %v658_v17, %v648_v43 }
 0x54f   :  { %v666_v2 = vrot.slane %v662_v31, 4  ;;  %v667_v42 = vrot.slane %v663_v56, 4  ;;  %v660_v58 = vsel %vm659_vm0, %v655_v62, %v630_v53  ;;  %v661_v8 = vsel %vm659_vm0, %v656_v13, %v636_v55 }
 0x551   :  { %v671_v18 = vsel %vm670_vm1, %v660_v58, %v666_v2  ;;  %v672_v20 = vsel %vm670_vm1, %v661_v8, %v667_v42 }
 0x552   :  { %v677_v21 = vadd.f32 %v675_v59, %v671_v18  ;;  %v678_v7 = vadd.f32 %v675_v59, %v672_v20 }
 0x554   :  { %v679_v12 = vadd.f32 %v677_v21, %v913_v33  ;;  %v680_v10 = vadd.f32 %v678_v7, %v916_v14 }
 0x556   :  { %681 = vst [vmem:[%s1038_s3] sm:$0xff] %v679_v12  ;;  %682 = vst [vmem:[%s1038_s3 + $0x8] sm:$0xff] %v680_v10 }

</bundles_post_ra>
